<compile_context>
chip_gen: v6e
topology: v6e:2x2x1
jax: 0.10.0
libtpu: 0.0.40
codegen_flags: <defaults>
</compile_context>

<pallas_src>
import functools

import jax
import jax.numpy as jnp
import numpy as np
from jax.experimental import pallas as pl
from jax.experimental.pallas import tpu as pltpu


def _game_dist_kernel(pcblk_ref, alenmax_ref, consts_ref,           # scalar prefetch (SMEM)
                      pc_ref, jl_ref, p0_ref, p1_ref, alen_ref,     # VMEM inputs
                      out_ref, *, block_r, apply_sigmoid):
    """One (u_block, block_r, 128) output tile for user-tile ug, column block bi."""
    ug = pl.program_id(0)
    bi = pl.program_id(1)
    base = bi * (block_r * 128)          # first action index of this column block

    @pl.when(base >= alenmax_ref[ug])
    def _zero_block():
        out_ref[...] = jnp.zeros_like(out_ref)

    @pl.when(base < alenmax_ref[ug])
    def _compute_block():
        pcblk = pcblk_ref[bi]                          # f32 scalar: popcount(block index)
        pc = pc_ref[...][None, :, :]                   # (1, block_r, 128) f32: popcount(local idx)
        jl = jl_ref[...][None, :, :]                   # (1, block_r, 128) i32: local idx
        rem = alen_ref[...][:, None, :] - base         # (u_block, 1, 128) i32
        mask = jl < rem                                # (u_block, block_r, 128)

        if apply_sigmoid:
            # temp = exp(popcount(j)*log_r + hlen*log(1-g)); per-step scalar part folded in.
            log_r = p1_ref[...][:, None, :]            # (u_block, 1, 128)
            s = p0_ref[...][:, None, :] + pcblk * log_r
            val = jnp.exp(pc * log_r + s)
        else:
            # else-branch of the reference: raw gamma[0] for every user; guard 0^0 == 1.
            # TODO(synk): gamma[0] outside [0, 1] (never produced by torch.rand init) would
            # need sign-aware integer pow to match torch.pow exactly (log() yields NaN).
            log_g = consts_ref[0]
            log_1mg = consts_ref[1]
            hlen = p0_ref[...][:, None, :]             # raw history_len (f32)
            a = pc + pcblk
            b = hlen - a
            t1 = jnp.where(a == 0.0, 1.0, jnp.exp(a * log_g))
            t2 = jnp.where(b == 0.0, 1.0, jnp.exp(b * log_1mg))
            val = t1 * t2

        out_ref[...] = jnp.where(mask, val, 0.0).astype(out_ref.dtype)


def game_distribution_forward_all(gamma, action_len, history_len, *,
                                  distribution_type=1, max_action=None,
                                  out_dtype=jnp.float32):
    """Batched Pallas implementation: temp for ALL users, shape (n_users, max_action)."""
    gamma = jnp.asarray(gamma, jnp.float32)
    action_len = jnp.asarray(action_len, jnp.int32)
    history_len = jnp.asarray(history_len, jnp.int32)
    n_users = gamma.shape[0]

    if distribution_type == 2:
        # temp = gamma[u] / action_len[u]  -> per-user scalar (matches reference); no kernel.
        return gamma / action_len.astype(jnp.float32)

    if max_action is None:
        # NOTE: concretizes action_len on the host; pass max_action explicitly when this
        # wrapper is placed under jit with a traced action_len.
        max_action = int(np.max(np.asarray(action_len)))

    apply_sigmoid = (distribution_type == 1)

    # ---- tiling: lane-dense (block_r, 128) action tiles; tile users too when rows are few ----
    rows = -(-max_action // 128)
    rows_p2 = max(8, 1 << (rows - 1).bit_length())   # pow2 (popcount decomposition needs pow2)
    TARGET_ROWS = 1024                               # ~512 KiB f32 per output block
    if rows_p2 >= TARGET_ROWS:
        block_r = TARGET_ROWS
        u_block = 1
    else:
        block_r = rows_p2
        u_block = max(1, min(n_users, TARGET_ROWS // block_r))
    rows_pad = -(-rows // block_r) * block_r
    num_blocks = rows_pad // block_r
    n_user_tiles = -(-n_users // u_block)
    n_users_pad = n_user_tiles * u_block

    # ---- host-precomputed constant tiles (no in-kernel iota / popcount VPU work) ----
    jl_np = np.arange(block_r * 128, dtype=np.int64).reshape(block_r, 128)
    pc_np = np.zeros((block_r, 128), np.int64)
    v = jl_np.copy()
    while v.any():
        pc_np += v & 1
        v >>= 1
    pc_local = jnp.asarray(pc_np, jnp.float32)
    j_local = jnp.asarray(jl_np, jnp.int32)
    pcblk_f = jnp.asarray([bin(b).count("1") for b in range(num_blocks)], jnp.float32)

    # ---- per-user scalars hoisted out of the kernel (one sigmoid/log per user, not per step) ----
    hlen_f = history_len.astype(jnp.float32)
    if apply_sigmoid:
        g = jax.nn.sigmoid(gamma)
        log_1mg = jnp.log1p(-g)
        p0 = hlen_f * log_1mg                 # hlen * log(1-g)
        p1 = jnp.log(g) - log_1mg             # log_r
        consts = jnp.zeros((2,), jnp.float32)
    else:
        g0 = gamma[0]
        consts = jnp.stack([jnp.log(g0), jnp.log1p(-g0)]).astype(jnp.float32)
        p0 = hlen_f
        p1 = jnp.zeros_like(hlen_f)

    def pad_u(x):
        return jnp.pad(x, (0, n_users_pad - n_users))

    def bcast_lanes(x):  # (n_users_pad,) -> (n_user_tiles, u_block, 128), lane-broadcast
        return jnp.broadcast_to(x[:, None], (n_users_pad, 128)).reshape(
            n_user_tiles, u_block, 128)

    alen_pad = pad_u(action_len)
    p0_t = bcast_lanes(pad_u(p0))
    p1_t = bcast_lanes(pad_u(p1))
    alen_t = bcast_lanes(alen_pad)
    alen_max = alen_pad.reshape(n_user_tiles, u_block).max(axis=1).astype(jnp.int32)

    kernel = functools.partial(_game_dist_kernel, block_r=block_r,
                               apply_sigmoid=apply_sigmoid)

    const_spec = pl.BlockSpec((block_r, 128), lambda ug, bi, *_: (0, 0))   # resident constants
    user_spec = pl.BlockSpec((None, u_block, 128), lambda ug, bi, *_: (ug, 0, 0))

    grid_spec = pltpu.PrefetchScalarGridSpec(
        num_scalar_prefetch=3,                     # pcblk_f, alen_max, consts -> SMEM
        grid=(n_user_tiles, num_blocks),
        in_specs=[const_spec, const_spec, user_spec, user_spec, user_spec],
        out_specs=pl.BlockSpec((None, u_block, block_r, 128),
                               lambda ug, bi, *_: (ug, 0, bi, 0)),
    )

    out = pl.pallas_call(
        kernel,
        out_shape=jax.ShapeDtypeStruct((n_user_tiles, u_block, rows_pad, 128), out_dtype),
        grid_spec=grid_spec,
        compiler_params=pltpu.CompilerParams(
            dimension_semantics=("parallel", "parallel")),
    )(pcblk_f, alen_max, consts, pc_local, j_local, p0_t, p1_t, alen_t)

    # Keep the kernel output 128-lane-dense; reshape/slice in the wrapper.
    return out.reshape(n_users_pad, rows_pad * 128)[:n_users, :max_action]


def game_distribution_forward(gamma, action_len, history_len, u, *,
                              distribution_type=1, max_action=None):
    """Per-user forward(u), matching the PyTorch module's signature/semantics."""
    if distribution_type == 2:
        gamma = jnp.asarray(gamma, jnp.float32)
        action_len = jnp.asarray(action_len, jnp.int32)
        return gamma[u] / action_len[u].astype(jnp.float32)
    temp_all = game_distribution_forward_all(
        gamma, action_len, history_len,
        distribution_type=distribution_type, max_action=max_action)
    return temp_all[u]


def _reference_numpy(gamma, alen, hlen):
    """Vectorized numpy mirror of the PyTorch forward loop (distribution_type == 1)."""
    n = gamma.shape[0]
    max_a = int(alen.max())
    j = np.arange(max_a, dtype=np.uint64)
    pc = np.zeros(max_a, np.int64)
    v = j.copy()
    while v.any():
        pc += (v & 1).astype(np.int64)
        v >>= 1
    out = np.zeros((n, max_a), np.float64)
    for i in range(n):
        g = 1.0 / (1.0 + np.exp(-float(gamma[i])))
        vals = (g ** pc) * ((1.0 - g) ** (int(hlen[i]) - pc))
        out[i] = np.where(j < int(alen[i]), vals, 0.0)
    return out.astype(np.float32)


if __name__ == "__main__":
    key = jax.random.PRNGKey(0)
    k1, k2 = jax.random.split(key)

    # --- test 1: small shapes -> user-tiled regime (u_block > 1, single column block) ---
    n_users = 8
    history_len = jnp.array([3, 5, 8, 4, 6, 2, 7, 5], dtype=jnp.int32)
    action_len = (2 ** history_len).astype(jnp.int32)      # actions enumerate history subsets
    gamma = jax.random.uniform(k1, (n_users,), dtype=jnp.float32)  # ~ torch.rand(n_users)

    temp_all = jax.block_until_ready(
        game_distribution_forward_all(gamma, action_len, history_len, distribution_type=1))
    ref = _reference_numpy(np.asarray(gamma), np.asarray(action_len), np.asarray(history_len))
    np.testing.assert_allclose(np.asarray(temp_all), ref, rtol=2e-4, atol=1e-7)

    # per-user forward(u) wrapper (user 2 has history_len = 8 -> action_len = 256 = max_action)
    u = 2
    t_u = jax.block_until_ready(
        game_distribution_forward(gamma, action_len, history_len, u, distribution_type=1))
    np.testing.assert_allclose(np.asarray(t_u), ref[u], rtol=2e-4, atol=1e-7)

    # distribution_type == 2 path (per-user scalar, as in the reference).
    t2 = jax.block_until_ready(
        game_distribution_forward(gamma, action_len, history_len, u, distribution_type=2))
    np.testing.assert_allclose(np.asarray(t2),
                               np.asarray(gamma)[u] / np.asarray(action_len)[u], rtol=1e-6)

    # --- test 2: large action space -> u_block == 1, multiple column blocks + skip branch ---
    history_len2 = jnp.array([18, 10, 18], dtype=jnp.int32)
    action_len2 = (2 ** history_len2).astype(jnp.int32)
    gamma2 = jax.random.uniform(k2, (3,), dtype=jnp.float32)

    temp_all2 = jax.block_until_ready(
        game_distribution_forward_all(gamma2, action_len2, history_len2, distribution_type=1))
    ref2 = _reference_numpy(np.asarray(gamma2), np.asarray(action_len2),
                            np.asarray(history_len2))
    np.testing.assert_allclose(np.asarray(temp_all2), ref2, rtol=2e-4, atol=1e-7)

    print("KERNEL_OK")
</pallas_src>

<mosaic_0001>
module attributes {stable_mosaic.version = 11 : i64} {
  func.func @_game_dist_kernel(%arg0: i32, %arg1: i32, %arg2: memref<1xf32, #tpu.memory_space<smem>>, %arg3: memref<1xi32, #tpu.memory_space<smem>>, %arg4: memref<2xf32, #tpu.memory_space<smem>>, %arg5: memref<8x128xf32, #tpu.memory_space<vmem>>, %arg6: memref<8x128xi32, #tpu.memory_space<vmem>>, %arg7: memref<1x8x128xf32, #tpu.memory_space<vmem>>, %arg8: memref<1x8x128xf32, #tpu.memory_space<vmem>>, %arg9: memref<1x8x128xi32, #tpu.memory_space<vmem>>, %arg10: memref<1x8x8x128xf32, #tpu.memory_space<vmem>>) attributes {dimension_semantics = [#tpu.dimension_semantics<parallel>, #tpu.dimension_semantics<parallel>], iteration_bounds = array<i64: 1, 1>, scalar_prefetch = 3 : i64, scratch_operands = 0 : i64, tpu.core_type = #tpu.core_type<tc>, window_params = [{pipeline_mode = #tpu.pipeline_mode<synchronous>, transform_indices = @transform_0, window_bounds = array<i64: 8, 128>}, {pipeline_mode = #tpu.pipeline_mode<synchronous>, transform_indices = @transform_1, window_bounds = array<i64: 8, 128>}, {transform_indices = @transform_2, window_bounds = array<i64: 1, 8, 128>}, {transform_indices = @transform_3, window_bounds = array<i64: 1, 8, 128>}, {transform_indices = @transform_4, window_bounds = array<i64: 1, 8, 128>}, {transform_indices = @transform_5, window_bounds = array<i64: 1, 8, 8, 128>}]} {
    %c1024_i32 = arith.constant 1024 : i32
    %0 = arith.muli %arg1, %c1024_i32 : i32
    %1 = arith.index_cast %arg0 : i32 to index
    %2 = memref.load %arg3[%1] : memref<1xi32, #tpu.memory_space<smem>>
    %3 = arith.cmpi sge, %0, %2 : i32
    %4 = arith.extui %3 : i1 to i32
    %c0_i32 = arith.constant 0 : i32
    %5 = arith.cmpi ne, %4, %c0_i32 : i32
    scf.if %5 {
      %cst = arith.constant 0.000000e+00 : f32
      %11 = vector.broadcast %cst : f32 to vector<8x8x128xf32>
      %c0 = arith.constant 0 : index
      %c0_1 = arith.constant 0 : index
      %c0_2 = arith.constant 0 : index
      %c0_3 = arith.constant 0 : index
      %12 = vector.load %arg10[%c0, %c0_1, %c0_2, %c0_3] : memref<1x8x8x128xf32, #tpu.memory_space<vmem>>, vector<1x8x8x128xf32>
      %13 = vector.shape_cast %12 : vector<1x8x8x128xf32> to vector<8x8x128xf32>
      %14 = vector.shape_cast %11 : vector<8x8x128xf32> to vector<1x8x8x128xf32>
      tpu.vector_store %arg10[%c0, %c0_1, %c0_2, %c0_3], %14 {strides = array<i32>} : memref<1x8x8x128xf32, #tpu.memory_space<vmem>>, vector<1x8x8x128xf32>,
    } else {
    }
    %6 = arith.index_cast %arg0 : i32 to index
    %7 = memref.load %arg3[%6] : memref<1xi32, #tpu.memory_space<smem>>
    %8 = arith.cmpi slt, %0, %7 : i32
    %9 = arith.extui %8 : i1 to i32
    %c0_i32_0 = arith.constant 0 : i32
    %10 = arith.cmpi ne, %9, %c0_i32_0 : i32
    scf.if %10 {
      %11 = arith.index_cast %arg1 : i32 to index
      %12 = memref.load %arg2[%11] : memref<1xf32, #tpu.memory_space<smem>>
      %c0 = arith.constant 0 : index
      %c0_1 = arith.constant 0 : index
      %13 = vector.load %arg5[%c0, %c0_1] : memref<8x128xf32, #tpu.memory_space<vmem>>, vector<8x128xf32>
      %14 = vector.shape_cast %13 : vector<8x128xf32> to vector<1x8x128xf32>
      %c0_2 = arith.constant 0 : index
      %c0_3 = arith.constant 0 : index
      %15 = vector.load %arg6[%c0_2, %c0_3] : memref<8x128xi32, #tpu.memory_space<vmem>>, vector<8x128xi32>
      %16 = vector.shape_cast %15 : vector<8x128xi32> to vector<1x8x128xi32>
      %c0_4 = arith.constant 0 : index
      %c0_5 = arith.constant 0 : index
      %c0_6 = arith.constant 0 : index
      %17 = vector.load %arg9[%c0_4, %c0_5, %c0_6] : memref<1x8x128xi32, #tpu.memory_space<vmem>>, vector<1x8x128xi32>
      %18 = vector.shape_cast %17 : vector<1x8x128xi32> to vector<8x128xi32>
      %19 = vector.shape_cast %18 : vector<8x128xi32> to vector<8x1x128xi32>
      %20 = vector.broadcast %0 : i32 to vector<8x1x128xi32>
      %21 = arith.subi %19, %20 : vector<8x1x128xi32>
      %22 = vector.broadcast %16 : vector<1x8x128xi32> to vector<8x8x128xi32>
      %23 = vector.broadcast %21 : vector<8x1x128xi32> to vector<8x8x128xi32>
      %24 = arith.cmpi slt, %22, %23 : vector<8x8x128xi32>
      %c0_7 = arith.constant 0 : index
      %c0_8 = arith.constant 0 : index
      %c0_9 = arith.constant 0 : index
      %25 = vector.load %arg8[%c0_7, %c0_8, %c0_9] : memref<1x8x128xf32, #tpu.memory_space<vmem>>, vector<1x8x128xf32>
      %26 = vector.shape_cast %25 : vector<1x8x128xf32> to vector<8x128xf32>
      %27 = vector.shape_cast %26 : vector<8x128xf32> to vector<8x1x128xf32>
      %c0_10 = arith.constant 0 : index
      %c0_11 = arith.constant 0 : index
      %c0_12 = arith.constant 0 : index
      %28 = vector.load %arg7[%c0_10, %c0_11, %c0_12] : memref<1x8x128xf32, #tpu.memory_space<vmem>>, vector<1x8x128xf32>
      %29 = vector.shape_cast %28 : vector<1x8x128xf32> to vector<8x128xf32>
      %30 = vector.shape_cast %29 : vector<8x128xf32> to vector<8x1x128xf32>
      %31 = vector.broadcast %12 : f32 to vector<8x1x128xf32>
      %32 = arith.mulf %31, %27 : vector<8x1x128xf32>
      %33 = arith.addf %30, %32 : vector<8x1x128xf32>
      %34 = vector.broadcast %14 : vector<1x8x128xf32> to vector<8x8x128xf32>
      %35 = vector.broadcast %27 : vector<8x1x128xf32> to vector<8x8x128xf32>
      %36 = arith.mulf %34, %35 : vector<8x8x128xf32>
      %37 = vector.broadcast %33 : vector<8x1x128xf32> to vector<8x8x128xf32>
      %38 = arith.addf %36, %37 : vector<8x8x128xf32>
      %39 = math.exp %38 : vector<8x8x128xf32>
      %cst = arith.constant 0.000000e+00 : f32
      %40 = vector.broadcast %cst : f32 to vector<8x8x128xf32>
      %41 = arith.select %24, %39, %40 : vector<8x8x128xi1>, vector<8x8x128xf32>
      %c0_13 = arith.constant 0 : index
      %c0_14 = arith.constant 0 : index
      %c0_15 = arith.constant 0 : index
      %c0_16 = arith.constant 0 : index
      %42 = vector.load %arg10[%c0_13, %c0_14, %c0_15, %c0_16] : memref<1x8x8x128xf32, #tpu.memory_space<vmem>>, vector<1x8x8x128xf32>
      %43 = vector.shape_cast %42 : vector<1x8x8x128xf32> to vector<8x8x128xf32>
      %44 = vector.shape_cast %41 : vector<8x8x128xf32> to vector<1x8x8x128xf32>
      tpu.vector_store %arg10[%c0_13, %c0_14, %c0_15, %c0_16], %44 {strides = array<i32>} : memref<1x8x8x128xf32, #tpu.memory_space<vmem>>, vector<1x8x8x128xf32>,
    } else {
    }
    return
  }
  func.func @transform_0(%arg0: i32, %arg1: i32, %arg2: memref<1xf32, #tpu.memory_space<smem>>, %arg3: memref<1xi32, #tpu.memory_space<smem>>, %arg4: memref<2xf32, #tpu.memory_space<smem>>) -> (i32, i32) {
    %c0_i32 = arith.constant 0 : i32
    %c0_i32_0 = arith.constant 0 : i32
    %c0_i32_1 = arith.constant 0 : i32
    return %c0_i32, %c0_i32_0 : i32, i32
  }
  func.func @transform_1(%arg0: i32, %arg1: i32, %arg2: memref<1xf32, #tpu.memory_space<smem>>, %arg3: memref<1xi32, #tpu.memory_space<smem>>, %arg4: memref<2xf32, #tpu.memory_space<smem>>) -> (i32, i32) {
    %c0_i32 = arith.constant 0 : i32
    %c0_i32_0 = arith.constant 0 : i32
    %c0_i32_1 = arith.constant 0 : i32
    return %c0_i32, %c0_i32_0 : i32, i32
  }
  func.func @transform_2(%arg0: i32, %arg1: i32, %arg2: memref<1xf32, #tpu.memory_space<smem>>, %arg3: memref<1xi32, #tpu.memory_space<smem>>, %arg4: memref<2xf32, #tpu.memory_space<smem>>) -> (i32, i32, i32) {
    %c0_i32 = arith.constant 0 : i32
    %c0_i32_0 = arith.constant 0 : i32
    %c0_i32_1 = arith.constant 0 : i32
    return %arg0, %c0_i32, %c0_i32_0 : i32, i32, i32
  }
  func.func @transform_3(%arg0: i32, %arg1: i32, %arg2: memref<1xf32, #tpu.memory_space<smem>>, %arg3: memref<1xi32, #tpu.memory_space<smem>>, %arg4: memref<2xf32, #tpu.memory_space<smem>>) -> (i32, i32, i32) {
    %c0_i32 = arith.constant 0 : i32
    %c0_i32_0 = arith.constant 0 : i32
    %c0_i32_1 = arith.constant 0 : i32
    return %arg0, %c0_i32, %c0_i32_0 : i32, i32, i32
  }
  func.func @transform_4(%arg0: i32, %arg1: i32, %arg2: memref<1xf32, #tpu.memory_space<smem>>, %arg3: memref<1xi32, #tpu.memory_space<smem>>, %arg4: memref<2xf32, #tpu.memory_space<smem>>) -> (i32, i32, i32) {
    %c0_i32 = arith.constant 0 : i32
    %c0_i32_0 = arith.constant 0 : i32
    %c0_i32_1 = arith.constant 0 : i32
    return %arg0, %c0_i32, %c0_i32_0 : i32, i32, i32
  }
  func.func @transform_5(%arg0: i32, %arg1: i32, %arg2: memref<1xf32, #tpu.memory_space<smem>>, %arg3: memref<1xi32, #tpu.memory_space<smem>>, %arg4: memref<2xf32, #tpu.memory_space<smem>>) -> (i32, i32, i32, i32) {
    %c0_i32 = arith.constant 0 : i32
    %c0_i32_0 = arith.constant 0 : i32
    %c0_i32_1 = arith.constant 0 : i32
    return %arg0, %c0_i32, %arg1, %c0_i32_0 : i32, i32, i32, i32
  }
}

</mosaic_0001>

<bundles_post_ra>
// kernel: tpu_custom_call.1
= control target key start
LH: loop header
LB: loop body
LE: loop exit
PB: predicated region body
PF: predicated region fallthrough
CT: control target
= control target key end

     0   :  { %s820_s0 = inlined_call_operand.<no memory space> [shape: f32[1], index: 0, kind: input, shape index: {}]   ;;  %s821_s1 = inlined_call_operand.<no memory space> [shape: s32[1], index: 1, kind: input, shape index: {}]   ;;  %s822_s2 = inlined_call_operand.vmem [shape: f32[2], index: 2, kind: input, shape index: {}]   ;;  %s823_s3 = inlined_call_operand.hbm [shape: f32[8,128], index: 3, kind: input, shape index: {}]   ;;  %s824_s4 = inlined_call_operand.hbm [shape: s32[8,128], index: 4, kind: input, shape index: {}]   ;;  %s825_s5 = inlined_call_operand.vmem [shape: f32[1,8,128], index: 5, kind: input, shape index: {}]   ;;  %s826_s6 = inlined_call_operand.hbm [shape: f32[1,8,128], index: 6, kind: input, shape index: {}]   ;;  %s827_s7 = inlined_call_operand.hbm [shape: s32[1,8,128], index: 7, kind: input, shape index: {}]   ;;  %s828_s8 = inlined_call_operand.hbm [shape: f32[1,8,8,128], index: 8, kind: output, shape index: {}]  }
   0x1   :  { %13 = sst [smem:[#allocation3]] %s820_s0  ;;  %s15_s9 = sshll.u32 %s822_s2, 4  ;;  %s16_s9 = int_to_ptr.vmem [resolvable:$true] %s15_s9 }
   0x2   :  { %14 = sst [smem:[#allocation4]] %s821_s1  ;;  %s523_s12 = scalar_lea.vmem %s16_s9, 16 }
   0x3   :  { %p524_p0 = scmp.ne.s32.totalorder %s16_s9, %s523_s12  ;;  %p528_p1 = scmp.lt.s32.totalorder %s16_s9, %s16_s9 }
   0x4   :  { %p529_p2 = scmp.lt.s32.totalorder %s523_s12, %s523_s12 }
   0x6   :  { %p530_p3 = por %p529_p2, %p528_p1 }
   0x8   :  { %p531_p4 = pnand %p530_p3, %p524_p0 }
   0xa   :  { %534 = shalt.err (!%p531_p4)  }
   0xb   :  { %s645_s13 = smov [#allocation5]  }
   0xc   :  { %18 = dma.vmem_to_smem %s16_s9, 16, %s645_s13, [#allocation2] }
   0xd   :  { %635 = dma.done.wait [#allocation2], 16 }
   0xe   :  { %636 = vsyncadd [#allocation2], 4294967280 }
   0xf   :  { %20 = sfence }
  0x10   :  { %21 = vsyncpa [#allocation7], 0 }
  0x11   :  { %22 = vsyncpa [#allocation10], 0 }
  0x12   :  { %23 = vsyncpa [#allocation13], 0 }
  0x13   :  { %24 = vsyncpa [#allocation8], 0  ;;  %s646_s0 = smov [#allocation9]   ;;  %s647_s1 = smov [#allocation6]  }
  0x14   :  { %s41_s2 = sshll.u32 %s646_s0, 4  ;;  %s31_s14 = sshll.u32 %s647_s1, 4  ;;  %s42_s2 = int_to_ptr.vmem [resolvable:$true] %s41_s2  ;;  %s32_s14 = int_to_ptr.vmem [resolvable:$true] %s31_s14 }
  0x15   :  { %s543_s15 = scalar_lea.vmem %s42_s2, 128  ;;  %p548_p6 = scmp.lt.s32.totalorder %s42_s2, %s42_s2 }
  0x16   :  { %p544_p5 = scmp.ne.s32.totalorder %s42_s2, %s543_s15  ;;  %p549_p7 = scmp.lt.s32.totalorder %s543_s15, %s543_s15 }
  0x18   :  { %p550_p8 = por %p549_p7, %p548_p6 }
  0x1a   :  { %p551_p9 = pnand %p550_p8, %p544_p5 }
  0x1c   :  { %554 = shalt.err (!%p551_p9)
}
  0x1d   :  { %44 = dma.hbm_to_vmem [thread:$0]  %s824_s4, 128, %s42_s2, [#allocation10]  }
  0x1e   :  { %s563_s18 = scalar_lea.vmem %s32_s14, 128  ;;  %p568_p11 = scmp.lt.s32.totalorder %s32_s14, %s32_s14 }
  0x1f   :  { %p564_p10 = scmp.ne.s32.totalorder %s32_s14, %s563_s18  ;;  %p569_p12 = scmp.lt.s32.totalorder %s563_s18, %s563_s18 }
  0x21   :  { %p570_p13 = por %p569_p12, %p568_p11 }
  0x23   :  { %p571_p0 = pnand %p570_p13, %p564_p10 }
  0x25   :  { %574 = shalt.err (!%p571_p0)
}
  0x26   :  { %34 = dma.hbm_to_vmem [thread:$0]  %s823_s3, 128, %s32_s14, [#allocation7]  }
  0x27   :  { %s648_s21 = smov [#allocation11]   ;;  %s649_s23 = smov [#allocation12]  }
  0x28   :  { %s53_s22 = sshll.u32 %s648_s21, 4  ;;  %s63_s24 = sshll.u32 %s649_s23, 4  ;;  %s54_s22 = int_to_ptr.vmem [resolvable:$true] %s53_s22  ;;  %s64_s24 = int_to_ptr.vmem [resolvable:$true] %s63_s24 }
  0x29   :  { %s583_s25 = scalar_lea.vmem %s54_s22, 128  ;;  %p588_p2 = scmp.lt.s32.totalorder %s54_s22, %s54_s22 }
  0x2a   :  { %p584_p1 = scmp.ne.s32.totalorder %s54_s22, %s583_s25  ;;  %p589_p3 = scmp.lt.s32.totalorder %s583_s25, %s583_s25 }
  0x2c   :  { %p590_p4 = por %p589_p3, %p588_p2 }
  0x2e   :  { %p591_p5 = pnand %p590_p4, %p584_p1 }
  0x30   :  { %594 = shalt.err (!%p591_p5)
}
  0x31   :  { %56 = dma.hbm_to_vmem [thread:$0]  %s826_s6, 128, %s54_s22, [#allocation10]  }
  0x32   :  { %s603_s27 = scalar_lea.vmem %s64_s24, 128  ;;  %p608_p7 = scmp.lt.s32.totalorder %s64_s24, %s64_s24 }
  0x33   :  { %p604_p6 = scmp.ne.s32.totalorder %s64_s24, %s603_s27  ;;  %p609_p8 = scmp.lt.s32.totalorder %s603_s27, %s603_s27 }
  0x35   :  { %p610_p9 = por %p609_p8, %p608_p7 }
  0x37   :  { %p611_p10 = pnand %p610_p9, %p604_p6 }
  0x39   :  { %614 = shalt.err (!%p611_p10)
}
  0x3a   :  { %66 = dma.hbm_to_vmem [thread:$0]  %s827_s7, 128, %s64_s24, [#allocation13]  }
  0x3b   :  { %637 = dma.done.wait [#allocation7], 128  }
  0x3c   :  { %638 = vsyncadd [#allocation7], 4294967168 }
  0x3d   :  { %639 = dma.done.wait [#allocation10], 256  }
  0x3e   :  { %640 = vsyncadd [#allocation10], 4294967040 }
  0x3f   :  { %641 = dma.done.wait [#allocation13], 128  }
  0x40   :  { %642 = vsyncadd [#allocation13], 4294967168  ;;  %s80_s29 = sld [smem:[#allocation4]] }
  0x46   :  { %p491_p11 = scmp.gt.s32.totalorder %s80_s29, 0 }
  0x48   :  { %84 = sbr.rel (%p491_p11) target bundleno = 82 (0x52), region = 41 }
  0x4d   :  { %v650_v0 = vmov 0.0  }
  0x4e   :  { %85 = vst [vmem:[#allocation14] sm:$0xff] %v650_v0  ;;  %86 = vst [vmem:[#allocation14 + $0x8] sm:$0xff] %v650_v0 }
  0x4f   :  { %87 = vst [vmem:[#allocation14 + $0x10] sm:$0xff] %v650_v0  ;;  %88 = vst [vmem:[#allocation14 + $0x18] sm:$0xff] %v650_v0 }
  0x50   :  { %89 = vst [vmem:[#allocation14 + $0x20] sm:$0xff] %v650_v0  ;;  %90 = vst [vmem:[#allocation14 + $0x28] sm:$0xff] %v650_v0 }
  0x51   :  { %91 = vst [vmem:[#allocation14 + $0x30] sm:$0xff] %v650_v0  ;;  %92 = vst [vmem:[#allocation14 + $0x38] sm:$0xff] %v650_v0 }
  0x52 PF:  { %s93_s6 = sld [smem:[#allocation4]] }
  0x58   :  { %p493_p12 = scmp.le.s32.totalorder %s93_s6, 0 }
  0x59   :  { %s98_s7 = sld [smem:[#allocation3]] (!%p493_p12) }
  0x5a   :  { %97 = sbr.rel (%p493_p12) target bundleno = 150 (0x96), region = 45 }
  0x5f   :  { %v106_v1 = vlaneseq  ;;  %v651_v2 = vmov 1966171168   ;;  %v200_v7 = vld [vmem:[#allocation11] sm:$0xff]  ;;  %v259_v8 = vld [vmem:[%s825_s5] sm:$0xff]  ;;  %v730_v12 = vstv %s98_s7  ;;  %v743_v30 = vld [vmem:[#allocation12] sm:$0xff] }
  0x60   :  { %v104_v3 = vunpack.c.l.s4 %v651_v2  ;;  %v733_v14 = vld [vmem:[#allocation6] sm:$0xff]  ;;  %v202_v24 = vcombine.high %v200_v7, %v200_v7  ;;  %v261_v25 = vcombine.high %v259_v8, %v259_v8 }
  0x61   :  { %v107_v4 = vshrl.u32 %v106_v1, 7 }
  0x62   :  { %v105_v5 = vunpack.c.0.s8 %v104_v3  ;;  %v102_v3 = vcombine.high %v743_v30, %v743_v30 }
  0x63   :  { %v726_v9 = vsub.s32 0, %v107_v4 }
  0x64   :  { %v721_v6 = vsub.s32 %v105_v5, %v107_v4 }
  0x66   :  { %v209_v10 = vrot.slane %v200_v7, %v721_v6  ;;  %v268_v11 = vrot.slane %v259_v8, %v721_v6  ;;  %v109_v34 = vrot.slane %v743_v30, %v721_v6  ;;  %v216_v43 = vrot.slane %v202_v24, %v721_v6 }
  0x67   :  { %v275_v44 = vrot.slane %v261_v25, %v721_v6 }
  0x68   :  { %v225_v13 = vrot.slane %v209_v10, %v721_v6  ;;  %v284_v15 = vrot.slane %v268_v11, %v721_v6  ;;  %v217_v16 = vcombine.high %v209_v10, %v209_v10  ;;  %v276_v17 = vcombine.high %v268_v11, %v268_v11  ;;  %v772_v11 = vld [vmem:[#allocation9] sm:$0xff] }
  0x69   :  { %v125_v49 = vrot.slane %v109_v34, %v721_v6  ;;  %v232_v51 = vrot.slane %v216_v43, %v721_v6  ;;  %v291_v56 = vrot.slane %v275_v44, %v721_v6  ;;  %v218_v61 = vcombine.high %v216_v43, %v216_v43 }
  0x6a   :  { %v319_v18 = vmul.f32 %v730_v12, %v225_v13  ;;  %v338_v19 = vrot.slane %v225_v13, %v726_v9  ;;  %v239_v20 = vrot.slane %v217_v16, %v721_v6  ;;  %v247_v21 = vcombine.high %v225_v13, %v225_v13 }
  0x6b   :  { %v298_v26 = vrot.slane %v276_v17, %v721_v6  ;;  %v306_v29 = vcombine.high %v284_v15, %v284_v15  ;;  %v323_v57 = vmul.f32 %v730_v12, %v232_v51  ;;  %v354_v58 = vrot.slane %v232_v51, %v726_v9 }
  0x6c   :  { %v327_v22 = vadd.f32 %v319_v18, %v284_v15  ;;  %v375_v23 = vmul.f32 %v338_v19, %v733_v14  ;;  %v320_v27 = vmul.f32 %v730_v12, %v239_v20  ;;  %v342_v28 = vrot.slane %v239_v20, %v726_v9 }
  0x6d   :  { %v321_v32 = vmul.f32 %v730_v12, %v247_v21  ;;  %v346_v33 = vrot.slane %v247_v21, %v726_v9  ;;  %v249_v40 = vcombine.high %v239_v20, %v239_v20  ;;  %v308_v42 = vcombine.high %v298_v26, %v298_v26 }
  0x6e   :  { %v394_v31 = vrot.slane %v327_v22, %v726_v9  ;;  %v328_v35 = vadd.f32 %v320_v27, %v298_v26  ;;  %v376_v36 = vmul.f32 %v342_v28, %v733_v14  ;;  %v277_v62 = vcombine.high %v275_v44, %v275_v44 }
  0x6f   :  { %v329_v38 = vadd.f32 %v321_v32, %v306_v29  ;;  %v377_v39 = vmul.f32 %v346_v33, %v733_v14  ;;  %v322_v47 = vmul.f32 %v730_v12, %v249_v40  ;;  %v350_v48 = vrot.slane %v249_v40, %v726_v9 }
  0x70   :  { %v431_v37 = vadd.f32 %v394_v31, %v375_v23  ;;  %v398_v41 = vrot.slane %v328_v35, %v726_v9  ;;  %v117_v63 = vcombine.high %v109_v34, %v109_v34  ;;  %v331_v0 = vadd.f32 %v323_v57, %v291_v56 }
  0x71   :  { %v402_v46 = vrot.slane %v329_v38, %v726_v9  ;;  %v330_v53 = vadd.f32 %v322_v47, %v308_v42  ;;  %v378_v54 = vmul.f32 %v350_v48, %v733_v14  ;;  %v379_v1 = vmul.f32 %v354_v58, %v733_v14 }
  0x72   :  { %v439_v45 = vmul.f32 1.442695, %v431_v37  ;;  %v432_v50 = vadd.f32 %v398_v41, %v376_v36  ;;  %v246_v4 = vrot.slane %v218_v61, %v721_v6  ;;  %v163_v5 = vrot.slane %v125_v49, %v726_v9 }
  0x73   :  { %v433_v52 = vadd.f32 %v402_v46, %v377_v39  ;;  %v406_v60 = vrot.slane %v330_v53, %v726_v9  ;;  %v410_v7 = vrot.slane %v331_v0, %v726_v9  ;;  %v305_v8 = vrot.slane %v277_v62, %v721_v6 }
  0x74   :  { %507 = vpow2.f32 %v439_v45  ;;  %v441_v55 = vmul.f32 1.442695, %v432_v50  ;;  %v248_v10 = vcombine.high %v232_v51, %v232_v51  ;;  %v324_v15 = vmul.f32 %v730_v12, %v246_v4 }
  0x75   :  { %v443_v59 = vmul.f32 1.442695, %v433_v52  ;;  %v434_v2 = vadd.f32 %v406_v60, %v378_v54  ;;  %v358_v16 = vrot.slane %v246_v4, %v726_v9  ;;  %v307_v17 = vcombine.high %v291_v56, %v291_v56 }
  0x76   :  { %509 = vpow2.f32 %v441_v55  ;;  %v139_v18 = vrot.slane %v117_v63, %v721_v6  ;;  %v147_v19 = vcombine.high %v125_v49, %v125_v49  ;;  %v435_v20 = vadd.f32 %v410_v7, %v379_v1 }
  0x77   :  { %511 = vpow2.f32 %v443_v59  ;;  %v445_v13 = vmul.f32 1.442695, %v434_v2  ;;  %v325_v21 = vmul.f32 %v730_v12, %v248_v10  ;;  %v332_v22 = vadd.f32 %v324_v15, %v305_v8 }
  0x78   :  { %v380_v23 = vmul.f32 %v358_v16, %v733_v14  ;;  %v362_v24 = vrot.slane %v248_v10, %v726_v9  ;;  %vm781_vm0 = vcmp.lt.s32.totalorder %v772_v11, %v163_v5  ;;  %v167_v26 = vrot.slane %v139_v18, %v726_v9 }
  0x79   :  { %513 = vpow2.f32 %v445_v13  ;;  %v447_v27 = vmul.f32 1.442695, %v435_v20  ;;  %v333_v28 = vadd.f32 %v325_v21, %v307_v17  ;;  %v414_v29 = vrot.slane %v332_v22, %v726_v9 }
  0x7a   :  { %v381_v30 = vmul.f32 %v362_v24, %v733_v14  ;;  %v250_v31 = vcombine.high %v246_v4, %v246_v4  ;;  %v309_v32 = vcombine.high %v305_v8, %v305_v8  ;;  %v171_v33 = vrot.slane %v147_v19, %v726_v9 }
  0x7b   :  { %v149_v34 = vcombine.high %v139_v18, %v139_v18  ;;  %515 = vpow2.f32 %v447_v27  ;;  %v418_v35 = vrot.slane %v333_v28, %v726_v9  ;;  %v436_v36 = vadd.f32 %v414_v29, %v380_v23 }
  0x7c   :  { %v326_v37 = vmul.f32 %v730_v12, %v250_v31  ;;  %v366_v38 = vrot.slane %v250_v31, %v726_v9  ;;  %vm793_vm1 = vcmp.lt.s32.totalorder %v772_v11, %v167_v26  ;;  %v116_v41 = vrot.slane %v102_v3, %v721_v6 }
  0x7d   :  { %v437_v42 = vadd.f32 %v418_v35, %v381_v30  ;;  %v449_v44 = vmul.f32 1.442695, %v436_v36  ;;  %vm194_vm2 = vcmp.lt.s32.totalorder %v772_v11, %v171_v33  ;;  %v175_v12 = vrot.slane %v149_v34, %v726_v9 }
  0x7e   :  { %v334_v45 = vadd.f32 %v326_v37, %v309_v32  ;;  %v382_v46 = vmul.f32 %v366_v38, %v733_v14  ;;  %v132_v49 = vrot.slane %v116_v41, %v721_v6  ;;  %v118_v53 = vcombine.high %v116_v41, %v116_v41 }
  0x7f   :  { %v451_v47 = vmul.f32 1.442695, %v437_v42  ;;  %517 = vpow2.f32 %v449_v44  ;;  %vm195_vm3 = vcmp.lt.s32.totalorder %v772_v11, %v175_v12 }
  0x80   :  { %v422_v50 = vrot.slane %v334_v45, %v726_v9  ;;  %v179_v54 = vrot.slane %v132_v49, %v726_v9  ;;  %v148_v56 = vcombine.high %v132_v49, %v132_v49  ;;  %v146_v59 = vrot.slane %v118_v53, %v721_v6 }
  0x81   :  { %v508_v39 = vpop.eup %507  ;;  %519 = vpow2.f32 %v451_v47 }
  0x82   :  { %v455_v43 = vsel %vm781_vm0, %v508_v39, 0.0  ;;  %v438_v55 = vadd.f32 %v422_v50, %v382_v46  ;;  %vm196_vm4 = vcmp.lt.s32.totalorder %v772_v11, %v179_v54  ;;  %v183_v61 = vrot.slane %v146_v59, %v726_v9 }
  0x83   :  { %463 = vst [vmem:[#allocation14] sm:$0xff] %v455_v43  ;;  %v510_v48 = vpop.eup %509  ;;  %v187_v63 = vrot.slane %v148_v56, %v726_v9  ;;  %v150_v1 = vcombine.high %v146_v59, %v146_v59 }
  0x84   :  { %v512_v51 = vpop.eup %511  ;;  %v456_v52 = vsel %vm793_vm1, %v510_v48, 0.0  ;;  %v453_v57 = vmul.f32 1.442695, %v438_v55  ;;  %vm197_vm5 = vcmp.lt.s32.totalorder %v772_v11, %v183_v61 }
  0x85   :  { %464 = vst [vmem:[#allocation14 + $0x8] sm:$0xff] %v456_v52  ;;  %v457_v14 = vsel %vm194_vm2, %v512_v51, 0.0  ;;  %vm198_vm6 = vcmp.lt.s32.totalorder %v772_v11, %v187_v63  ;;  %v191_v6 = vrot.slane %v150_v1, %v726_v9 }
  0x86   :  { %465 = vst [vmem:[#allocation14 + $0x10] sm:$0xff] %v457_v14  ;;  %v514_v58 = vpop.eup %513  ;;  %521 = vpow2.f32 %v453_v57 }
  0x87   :  { %v458_v60 = vsel %vm195_vm3, %v514_v58, 0.0  ;;  %vm199_vm7 = vcmp.lt.s32.totalorder %v772_v11, %v191_v6 }
  0x88   :  { %466 = vst [vmem:[#allocation14 + $0x18] sm:$0xff] %v458_v60  ;;  %v516_v62 = vpop.eup %515 }
  0x89   :  { %v459_v0 = vsel %vm196_vm4, %v516_v62, 0.0 }
  0x8a   :  { %467 = vst [vmem:[#allocation14 + $0x20] sm:$0xff] %v459_v0 }
  0x8c   :  { %v518_v2 = vpop.eup %517 }
  0x8d   :  { %v460_v4 = vsel %vm197_vm5, %v518_v2, 0.0 }
  0x8e   :  { %v520_v3 = vpop.eup %519  ;;  %468 = vst [vmem:[#allocation14 + $0x28] sm:$0xff] %v460_v4 }
  0x8f   :  { %v461_v5 = vsel %vm198_vm6, %v520_v3, 0.0 }
  0x90   :  { %469 = vst [vmem:[#allocation14 + $0x30] sm:$0xff] %v461_v5 }
  0x93   :  { %v522_v7 = vpop.eup %521 }
  0x94   :  { %v462_v8 = vsel %vm199_vm7, %v522_v7, 0.0 }
  0x95   :  { %470 = vst [vmem:[#allocation14 + $0x38] sm:$0xff] %v462_v8 }
  0x96 PF:  { %s652_s5 = smov [#allocation14]  }
  0x97   :  { %s476_s10 = sshll.u32 %s652_s5, 4  ;;  %s477_s10 = int_to_ptr.vmem [resolvable:$true] %s476_s10 }
  0x98   :  { %s615_s11 = scalar_lea.vmem %s477_s10, 1024  ;;  %p620_p0 = scmp.lt.s32.totalorder %s477_s10, %s477_s10 }
  0x99   :  { %p616_p13 = scmp.ne.s32.totalorder %s477_s10, %s615_s11  ;;  %p621_p1 = scmp.lt.s32.totalorder %s615_s11, %s615_s11 }
  0x9b   :  { %p622_p2 = por %p621_p1, %p620_p0 }
  0x9d   :  { %p623_p3 = pnand %p622_p2, %p616_p13 }
  0x9f   :  { %626 = shalt.err (!%p623_p3)
}
  0xa0   :  { %s653_s12 = smov 128   ;;  %s654_s13 = smov 8  }
  0xa1   :  { %482 = dma.vmem_to_hbm [thread:$0]  %s477_s10, 1024, %s828_s8, [#allocation8], %s653_s12, %s653_s12, %s654_s13  }
  0xa2   :  { %643 = dma.done.wait [#allocation8], 1024  }
  0xa3   :  { %644 = vsyncadd [#allocation8], 4294966272 }
  0xa4   :  { %486 = vsyncpa [#allocation7], 1 }
  0xa5   :  { %487 = vsyncpa [#allocation10], 1 }
  0xa6   :  { %488 = vsyncpa [#allocation13], 1 }
  0xa7   :  { %489 = vsyncpa [#allocation8], 1 }

</bundles_post_ra>
